<compile_context>
chip_gen: v6e
topology: v6e:2x2x1
jax: 0.10.0
libtpu: 0.0.40
codegen_flags: <defaults>
</compile_context>

<pallas_src>
import jax
import jax.numpy as jnp
from jax.experimental import pallas as pl
from jax.experimental.pallas import tpu as pltpu


def attention_kernel(hid_ref, wh_ref, off_ref, out_ref):
    # hid_ref: (S, tB, H) VMEM  encoder hidden states for this batch tile
    # wh_ref:  (1, H)     VMEM  Linear weight half acting on hiddens
    # off_ref: (tB, 1)    VMEM  precomputed st[b].w_s + bias per batch row
    # out_ref: (tB, S)    VMEM  attention weights, S lane-dense
    S, tB, H = hid_ref.shape

    hid = hid_ref[...]                                    # (S, tB, H)
    w_h = wh_ref[...].reshape(1, 1, H)                    # (1, 1, H)

    # energy[b, s] = relu( <hiddens[s, b, :], w_h> + (st[b].w_s + bias) )
    # VPU multiply + lane reduce over H; no MXU (its output dim would be 1).
    score = jnp.sum(hid * w_h, axis=-1)                   # (S, tB)
    energy = jnp.maximum(score.T + off_ref[...], 0.0)     # (tB, S)

    # Softmax over the sequence axis (PyTorch dim=0), now the lane axis.
    m = jnp.max(energy, axis=-1, keepdims=True)           # (tB, 1)
    e = jnp.exp(energy - m)                                # (tB, S)
    denom = jnp.sum(e, axis=-1, keepdims=True)             # (tB, 1)
    out_ref[...] = (e / denom).astype(out_ref.dtype)        # (tB, S)


def _pick_batch_tile(S, B, H, *, dtype_bytes=4, budget_bytes=12 * 1024 * 1024):
    """Largest batch tile whose double-buffered hiddens slab fits the budget."""
    if B <= 8:
        return B                               # block equals the full batch dim
    per_row = 2 * S * H * dtype_bytes          # double-buffered (S, 1, H) row
    tb = min(B, max(8, budget_bytes // max(per_row, 1)))
    if tb >= B:
        return B
    return max(8, (tb // 8) * 8)               # keep partial tiles sublane-aligned


def attention_forward(st, hiddens, weight, bias):
    """st: (1,B,H), hiddens: (S,B,H), weight: (1,2H), bias: (1,) -> (B,1,S)."""
    S, B, H = hiddens.shape
    # Split Linear(2H -> 1): first H columns hit `st`, last H hit `hiddens`
    # (concat order in the PyTorch module is [st, hiddens]).
    w_s = weight[:, :H]                                    # (1, H)
    w_h = weight[:, H:].astype(jnp.float32)                # (1, H)
    # st contribution + bias is a tiny batch-sized matvec; do it in the wrapper
    # (fuses into surrounding XLA) so the kernel only reduces over hiddens.
    offset = (st[0] @ w_s.T + bias).astype(jnp.float32)    # (B, 1)

    tB = _pick_batch_tile(S, B, H)
    grid = (pl.cdiv(B, tB),)

    out2d = pl.pallas_call(
        attention_kernel,
        out_shape=jax.ShapeDtypeStruct((B, S), jnp.float32),
        grid=grid,
        in_specs=[
            pl.BlockSpec((S, tB, H), lambda b: (0, b, 0)),   # hiddens tile
            pl.BlockSpec((1, H), lambda b: (0, 0)),          # w_h (replicated)
            pl.BlockSpec((tB, 1), lambda b: (b, 0)),         # per-batch offset
        ],
        out_specs=pl.BlockSpec((tB, S), lambda b: (b, 0)),   # lane-dense (B, S)
        compiler_params=pltpu.CompilerParams(
            dimension_semantics=("parallel",),               # 2 TCs on v7x
            vmem_limit_bytes=48 * 1024 * 1024,               # explicit, < v7x 64 MiB
        ),
    )(hiddens.astype(jnp.float32), w_h, offset)

    # (B, S) -> (B, 1, S): free layout plumbing outside the kernel.
    return out2d.reshape(B, 1, S)


def attention_ref(st, hiddens, weight, bias):
    """Pure-JAX reference mirroring the PyTorch forward exactly."""
    S = hiddens.shape[0]
    st_rep = jnp.tile(st, (S, 1, 1))                        # (S, B, H)
    concat = jnp.concatenate([st_rep, hiddens], axis=2)     # (S, B, 2H)
    energy = jnp.maximum(concat @ weight.T + bias, 0.0)     # (S, B, 1)
    weights = jax.nn.softmax(energy, axis=0)                # (S, B, 1)
    return jnp.transpose(weights, (1, 2, 0))                # (B, 1, S)


if __name__ == "__main__":
    S, B, H = 8, 2, 32          # seq_len, batch, hidden
    input_size = 2 * H          # Linear(input_size, 1)

    key = jax.random.PRNGKey(0)
    k_st, k_hid, k_w, k_b = jax.random.split(key, 4)

    st = jax.random.normal(k_st, (1, B, H), dtype=jnp.float32)
    hiddens = jax.random.normal(k_hid, (S, B, H), dtype=jnp.float32)

    # Deterministic Linear(2H, 1) init (PyTorch-style uniform bound 1/sqrt(fan_in)).
    bound = 1.0 / (input_size ** 0.5)
    weight = jax.random.uniform(k_w, (1, input_size), jnp.float32, -bound, bound)
    bias = jax.random.uniform(k_b, (1,), jnp.float32, -bound, bound)

    out = attention_forward(st, hiddens, weight, bias)
    out = jax.block_until_ready(out)

    ref = attention_ref(st, hiddens, weight, bias)
    assert out.shape == (B, 1, S)
    assert jnp.allclose(out, ref, atol=1e-5, rtol=1e-5), "mismatch vs reference"

    print("KERNEL_OK")
</pallas_src>

<mosaic_0001>
module attributes {stable_mosaic.version = 11 : i64} {
  func.func @attention_kernel(%arg0: i32, %arg1: memref<8x2x32xf32, #tpu.memory_space<vmem>>, %arg2: memref<1x32xf32, #tpu.memory_space<vmem>>, %arg3: memref<2x1xf32, #tpu.memory_space<vmem>>, %arg4: memref<2x8xf32, #tpu.memory_space<vmem>>) attributes {dimension_semantics = [#tpu.dimension_semantics<parallel>], iteration_bounds = array<i64: 1>, scalar_prefetch = 0 : i64, scratch_operands = 0 : i64, tpu.core_type = #tpu.core_type<tc>, window_params = [{transform_indices = @transform_0, window_bounds = array<i64: 8, 2, 32>}, {pipeline_mode = #tpu.pipeline_mode<synchronous>, transform_indices = @transform_1, window_bounds = array<i64: 1, 32>}, {transform_indices = @transform_2, window_bounds = array<i64: 2, 1>}, {transform_indices = @transform_3, window_bounds = array<i64: 2, 8>}]} {
    %c0 = arith.constant 0 : index
    %c0_0 = arith.constant 0 : index
    %c0_1 = arith.constant 0 : index
    %0 = vector.load %arg1[%c0, %c0_0, %c0_1] : memref<8x2x32xf32, #tpu.memory_space<vmem>>, vector<8x2x32xf32>
    %c0_2 = arith.constant 0 : index
    %c0_3 = arith.constant 0 : index
    %1 = vector.load %arg2[%c0_2, %c0_3] : memref<1x32xf32, #tpu.memory_space<vmem>>, vector<1x32xf32>
    %2 = vector.shape_cast %1 : vector<1x32xf32> to vector<1x1x32xf32>
    %3 = vector.broadcast %2 : vector<1x1x32xf32> to vector<8x2x32xf32>
    %4 = arith.mulf %0, %3 : vector<8x2x32xf32>
    %cst = arith.constant dense<0.000000e+00> : vector<8x2xf32>
    %5 = vector.multi_reduction <add>, %4, %cst [2] : vector<8x2x32xf32> to vector<8x2xf32>
    %6 = tpu.transpose %5, [1, 0] : vector<8x2xf32> -> vector<2x8xf32>
    %c0_4 = arith.constant 0 : index
    %c0_5 = arith.constant 0 : index
    %7 = vector.load %arg3[%c0_4, %c0_5] : memref<2x1xf32, #tpu.memory_space<vmem>>, vector<2x1xf32>
    %8 = vector.broadcast %7 : vector<2x1xf32> to vector<2x8xf32>
    %9 = arith.addf %6, %8 : vector<2x8xf32>
    %cst_6 = arith.constant 0.000000e+00 : f32
    %10 = vector.broadcast %cst_6 : f32 to vector<2x8xf32>
    %11 = arith.maximumf %9, %10 : vector<2x8xf32>
    %cst_7 = arith.constant dense<0xFF800000> : vector<2xf32>
    %12 = vector.multi_reduction <maximumf>, %11, %cst_7 [1] : vector<2x8xf32> to vector<2xf32>
    %13 = vector.shape_cast %12 : vector<2xf32> to vector<2x1xf32>
    %14 = vector.broadcast %13 : vector<2x1xf32> to vector<2x8xf32>
    %15 = arith.subf %11, %14 : vector<2x8xf32>
    %16 = math.exp %15 : vector<2x8xf32>
    %cst_8 = arith.constant dense<0.000000e+00> : vector<2xf32>
    %17 = vector.multi_reduction <add>, %16, %cst_8 [1] : vector<2x8xf32> to vector<2xf32>
    %18 = vector.shape_cast %17 : vector<2xf32> to vector<2x1xf32>
    %19 = vector.broadcast %18 : vector<2x1xf32> to vector<2x8xf32>
    %20 = arith.divf %16, %19 : vector<2x8xf32>
    %c0_9 = arith.constant 0 : index
    %c0_10 = arith.constant 0 : index
    %21 = vector.load %arg4[%c0_9, %c0_10] : memref<2x8xf32, #tpu.memory_space<vmem>>, vector<2x8xf32>
    tpu.vector_store %arg4[%c0_9, %c0_10], %20 {strides = array<i32>} : memref<2x8xf32, #tpu.memory_space<vmem>>, vector<2x8xf32>,
    return
  }
  func.func @transform_0(%arg0: i32) -> (i32, i32, i32) {
    %c0_i32 = arith.constant 0 : i32
    %c0_i32_0 = arith.constant 0 : i32
    %c0_i32_1 = arith.constant 0 : i32
    return %c0_i32, %arg0, %c0_i32_0 : i32, i32, i32
  }
  func.func @transform_1(%arg0: i32) -> (i32, i32) {
    %c0_i32 = arith.constant 0 : i32
    %c0_i32_0 = arith.constant 0 : i32
    %c0_i32_1 = arith.constant 0 : i32
    return %c0_i32, %c0_i32_0 : i32, i32
  }
  func.func @transform_2(%arg0: i32) -> (i32, i32) {
    %c0_i32 = arith.constant 0 : i32
    %c0_i32_0 = arith.constant 0 : i32
    return %arg0, %c0_i32 : i32, i32
  }
  func.func @transform_3(%arg0: i32) -> (i32, i32) {
    %c0_i32 = arith.constant 0 : i32
    %c0_i32_0 = arith.constant 0 : i32
    return %arg0, %c0_i32 : i32, i32
  }
}

</mosaic_0001>

<bundles_post_ra>
// kernel: tpu_custom_call.1
= control target key start
LH: loop header
LB: loop body
LE: loop exit
PB: predicated region body
PF: predicated region fallthrough
CT: control target
= control target key end

     0   :  { %8 = vsyncpa [#allocation3], 0  ;;  %s306_s0 = inlined_call_operand.hbm [shape: f32[8,2,32], index: 0, kind: input, shape index: {}]   ;;  %s307_s1 = inlined_call_operand.vmem [shape: f32[1,32], index: 1, kind: input, shape index: {}]   ;;  %s308_s2 = inlined_call_operand.vmem [shape: f32[2,1], index: 2, kind: input, shape index: {}]   ;;  %s309_s3 = inlined_call_operand.hbm [shape: f32[2,8], index: 3, kind: output, shape index: {}]  }
   0x1   :  { %9 = vsyncpa [#allocation4], 0  ;;  %s258_s12 = smov [#allocation2]  }
   0x2   :  { %s15_s13 = sshll.u32 %s258_s12, 4  ;;  %s16_s13 = int_to_ptr.vmem [resolvable:$true] %s15_s13 }
   0x3   :  { %s222_s14 = scalar_lea.vmem %s16_s13, 256  ;;  %p227_p1 = scmp.lt.s32.totalorder %s16_s13, %s16_s13 }
   0x4   :  { %p223_p0 = scmp.ne.s32.totalorder %s16_s13, %s222_s14  ;;  %p228_p2 = scmp.lt.s32.totalorder %s222_s14, %s222_s14 }
   0x6   :  { %p229_p3 = por %p228_p2, %p227_p1 }
   0x8   :  { %p230_p4 = pnand %p229_p3, %p223_p0 }
   0xa   :  { %233 = shalt.err (!%p230_p4)
}
   0xb   :  { %s259_s15 = smov 32   ;;  %s260_s16 = smov 2  }
   0xc   :  { %21 = dma.hbm_to_vmem [thread:$0]  %s306_s0, 256, %s16_s13, [#allocation3], %s259_s15, %s259_s15, %s260_s16  }
   0xd   :  { %254 = dma.done.wait [#allocation3], 256  }
   0xe   :  { %255 = vsyncadd [#allocation3], 4294967040  ;;  %vm52_vm0 = vcmask 254976   ;;  %v29_v0 = vld [vmem:[#allocation2] sm:$0x3]  ;;  %v261_v25 = vmov 0   ;;  %v85_v27 = vlaneseq }
   0xf   :  { %v202_v1 = vld [vmem:[%s307_s1] ss:$0 sm:$0xff]  ;;  %v31_v2 = vld [vmem:[#allocation2 + $0x4] sm:$0x3]  ;;  %v30_v5 = vld [vmem:[#allocation2 + $0x2] sm:$0x3]  ;;  %209 = vset.pattern.permute.xlu0 %v261_v25 }
  0x10   :  { %v44_v3 = vmul.f32 %v202_v1, %v29_v0  ;;  %v46_v4 = vmul.f32 %v202_v1, %v31_v2  ;;  %v32_v6 = vld [vmem:[#allocation2 + $0x6] sm:$0x3]  ;;  %v45_v7 = vmul.f32 %v202_v1, %v30_v5  ;;  %v33_v9 = vld [vmem:[#allocation2 + $0x8] sm:$0x3]  ;;  %v34_v10 = vld [vmem:[#allocation2 + $0xa] sm:$0x3] }
  0x11   :  { %v47_v8 = vmul.f32 %v202_v1, %v32_v6  ;;  %v48_v15 = vmul.f32 %v202_v1, %v33_v9  ;;  %v49_v16 = vmul.f32 %v202_v1, %v34_v10  ;;  %v35_v17 = vld [vmem:[#allocation2 + $0xc] sm:$0x3]  ;;  %v36_v18 = vld [vmem:[#allocation2 + $0xe] sm:$0x3]  ;;  %v166_v26 = vld [vmem:[%s308_s2] sm:$0x3] }
  0x12   :  { %v53_v11 = vsel %vm52_vm0, %v44_v3, 0.0  ;;  %v59_v12 = vsel %vm52_vm0, %v46_v4, 0.0  ;;  %v56_v13 = vsel %vm52_vm0, %v45_v7, 0.0  ;;  %v50_v21 = vmul.f32 %v202_v1, %v35_v17  ;;  %s262_s2 = smov [#allocation5]  }
  0x13   :  { %54 = vadd.xlane.f32.xlu0 %v53_v11  ;;  %60 = vadd.xlane.f32.xlu1 %v59_v12  ;;  %v62_v14 = vsel %vm52_vm0, %v47_v8, 0.0  ;;  %v65_v19 = vsel %vm52_vm0, %v48_v15, 0.0  ;;  %v68_v20 = vsel %vm52_vm0, %v49_v16, 0.0  ;;  %v51_v22 = vmul.f32 %v202_v1, %v36_v18  ;;  %s193_s21 = sshll.u32 %s262_s2, 4  ;;  %s194_s21 = int_to_ptr.vmem [resolvable:$true] %s193_s21 }
  0x14   :  { %v71_v23 = vsel %vm52_vm0, %v50_v21, 0.0  ;;  %v86_v28 = vand.u32 127, %v85_v27  ;;  %v88_v29 = vshrl.u32 %v85_v27, 7  ;;  %vm119_vm1 = vcmask 1041409   ;;  %s234_s22 = scalar_lea.vmem %s194_s21, 32  ;;  %p239_p6 = scmp.lt.s32.totalorder %s194_s21, %s194_s21 }
  0x15   :  { %v74_v24 = vsel %vm52_vm0, %v51_v22, 0.0  ;;  %vm121_vm2 = vcmask 1042434   ;;  %vm123_vm3 = vcmask 1043459   ;;  %vm125_vm4 = vcmask 1044484   ;;  %p235_p5 = scmp.ne.s32.totalorder %s194_s21, %s234_s22  ;;  %p240_p7 = scmp.lt.s32.totalorder %s234_s22, %s234_s22 }
  0x16   :  { %v89_v32 = vsub.s32 %v86_v28, %v88_v29  ;;  %vm127_vm5 = vcmask 1045509   ;;  %vm129_vm6 = vcmask 1046534   ;;  %vm131_vm7 = vcmask 1047559  }
  0x17   :  { %57 = vadd.xlane.f32.xlu0 %v56_v13  ;;  %63 = vadd.xlane.f32.xlu1 %v62_v14  ;;  %vm174_vm8 = vcmask 58368   ;;  %p241_p8 = por %p240_p7, %p239_p6 }
  0x19   :  { %p242_p9 = pnand %p241_p8, %p235_p5 }
  0x1b   :  { %66 = vadd.xlane.f32.xlu0 %v65_v19  ;;  %69 = vadd.xlane.f32.xlu1 %v68_v20 }
  0x1f   :  { %72 = vadd.xlane.f32.xlu0 %v71_v23  ;;  %75 = vadd.xlane.f32.xlu1 %v74_v24 }
  0x35   :  { %169 = vperm.xlu0 %209, %v166_v26  }
  0x9c   :  { %v55_v30 = vpop.xlane.xlu0 %54  ;;  %v61_v31 = vpop.xlane.xlu1 %60 }
  0x9d   :  { %v90_v35 = vrot.slane %v55_v30, %v89_v32  ;;  %v98_v38 = vrot.slane %v61_v31, %v89_v32 }
  0xa0   :  { %v58_v33 = vpop.xlane.xlu0 %57  ;;  %v64_v34 = vpop.xlane.xlu1 %63 }
  0xa1   :  { %v94_v36 = vrot.slane %v58_v33, %v89_v32  ;;  %v102_v37 = vrot.slane %v64_v34, %v89_v32 }
  0xa3   :  { %v120_v39 = vsel %vm119_vm1, %v94_v36, %v90_v35 }
  0xa4   :  { %v122_v40 = vsel %vm121_vm2, %v98_v38, %v120_v39  ;;  %v67_v41 = vpop.xlane.xlu0 %66  ;;  %v70_v42 = vpop.xlane.xlu1 %69 }
  0xa5   :  { %v124_v43 = vsel %vm123_vm3, %v102_v37, %v122_v40  ;;  %v106_v44 = vrot.slane %v67_v41, %v89_v32  ;;  %v110_v45 = vrot.slane %v70_v42, %v89_v32 }
  0xa7   :  { %v126_v46 = vsel %vm125_vm4, %v106_v44, %v124_v43 }
  0xa8   :  { %v73_v47 = vpop.xlane.xlu0 %72  ;;  %v76_v48 = vpop.xlane.xlu1 %75  ;;  %v128_v51 = vsel %vm127_vm5, %v110_v45, %v126_v46 }
  0xa9   :  { %v114_v49 = vrot.slane %v73_v47, %v89_v32  ;;  %v118_v50 = vrot.slane %v76_v48, %v89_v32 }
  0xab   :  { %v130_v52 = vsel %vm129_vm6, %v114_v49, %v128_v51 }
  0xac   :  { %v132_v53 = vsel %vm131_vm7, %v118_v50, %v130_v52 }
  0xad   :  { %134 = vxpose.xlu1.b32.start.end [1/1] (short) (narrow) %v132_v53, 8 }
  0xb0   :  { %v170_v54 = vpop.permute.xlu0 %169 }
 0x129   :  { %v150_v55 = vpop.trf.xlu1 }
 0x12a   :  { %v172_v56 = vadd.f32 %v170_v54, %v150_v55 }
 0x12c   :  { %v173_v57 = vmax.f32 %v172_v56, 0.0 }
 0x12e   :  { %v175_v58 = vsel %vm174_vm8, %v173_v57, -inf }
 0x12f   :  { %176 = vmax.xlane.f32.xlu0 %v175_v58 }
 0x1b8   :  { %v177_v59 = vpop.xlane.xlu0 %176 }
 0x1b9   :  { %v178_v60 = vsub.f32 %v173_v57, %v177_v59 }
 0x1bb   :  { %v179_v61 = vmul.f32 1.442695, %v178_v60 }
 0x1bd   :  { %210 = vpow2.f32 %v179_v61 }
 0x1ca   :  { %v211_v62 = vpop.eup %210 }
 0x1cb   :  { %v181_v63 = vsel %vm174_vm8, %v211_v62, 0.0 }
 0x1cc   :  { %182 = vadd.xlane.f32.xlu1 %v181_v63 }
 0x255   :  { %v183_v0 = vpop.xlane.xlu1 %182 }
 0x256   :  { %212 = vrcp.f32 %v183_v0 }
 0x263   :  { %v213_v1 = vpop.eup %212 }
 0x264   :  { %v185_v2 = vmul.f32 %v213_v1, %v211_v62 }
 0x266   :  { %186 = vst.msk [vmem:[#allocation5] sm:$0x3] %vm174_vm8, %v185_v2 }
 0x267   :  { %245 = shalt.err (!%p242_p9)
}
 0x268   :  { %196 = dma.vmem_to_hbm [thread:$0]  %s194_s21, 32, %s309_s3, [#allocation4]  }
 0x269   :  { %256 = dma.done.wait [#allocation4], 32  }
 0x26a   :  { %257 = vsyncadd [#allocation4], 4294967264 }
 0x26b   :  { %200 = vsyncpa [#allocation3], 1 }
 0x26c   :  { %201 = vsyncpa [#allocation4], 1 }

</bundles_post_ra>
